<compile_context>
chip_gen: v5e
topology: v5e:2x2
jax: 0.10.0
libtpu: 0.0.40
codegen_flags: <defaults>
</compile_context>

<pallas_src>
from functools import lru_cache, partial

import jax
import jax.numpy as jnp
from jax import lax
from jax.experimental import pallas as pl
from jax.experimental.pallas import tpu as pltpu

_LANES = 128
_SUBLANES = 8
_TARGET_TILE_BYTES = 2 << 20      # ~2 MiB per input tile (per the roofline knee)


def _cdiv(a, b):
    return -(-a // b)


@lru_cache(maxsize=1)
def _num_tensorcores():
    """Best-effort TensorCores-per-device: 2 on megacore-style parts (v4/v5p/v7x), else 1."""
    try:
        dev = jax.devices()[0]
        if dev.platform != "tpu":
            return 1
        kind = (getattr(dev, "device_kind", "") or "").lower()
        if any(tag in kind for tag in ("v7", "7x", "v4", "v5p")):
            return 2
    except Exception:
        pass
    return 1


def _sse_kernel(p_ref, t_ref, out_ref, acc_ref, *, rows_valid, apply_mask):
    """Accumulate per-lane sum((p - t)^2) over the inner ("arbitrary") grid axis."""
    i = pl.program_id(1)

    @pl.when(i == 0)
    def _():
        acc_ref[...] = jnp.zeros_like(acc_ref)

    d = p_ref[...].astype(jnp.float32) - t_ref[...].astype(jnp.float32)
    sq = d * d

    if apply_mask:
        # Edge blocks read past the last valid row (undefined data); select 0 there.
        # jnp.where (select) does not propagate NaN/Inf from the unselected branch,
        # and the extra iota/compare/select is free filler on a DMA-bound kernel.
        block_rows = p_ref.shape[0]
        logical_block = pl.program_id(0) * pl.num_programs(1) + i
        row0 = logical_block * block_rows
        global_row = row0 + lax.broadcasted_iota(jnp.int32, sq.shape, 0)
        sq = jnp.where(global_row < rows_valid, sq, 0.0)

    # Fold sublane groups: (block_rows, 128) -> (block_rows//8, 8, 128), sum leading
    # axis.  Pure elementwise vreg adds (VPU); the cross-lane reduce happens outside.
    acc_ref[...] += jnp.sum(sq.reshape(-1, _SUBLANES, _LANES), axis=0)

    @pl.when(i == pl.num_programs(1) - 1)
    def _():
        out_ref[...] = acc_ref[...]


@jax.jit
def _sse_pallas(preds, target):
    """Pallas-computed sum of squared errors over two same-shape arrays (f32 scalar)."""
    n = preds.size
    p = preds.reshape(-1)
    t = target.reshape(-1)

    # ----- static tiling (Python math on static shapes/dtypes under jit) -----
    itemsizes = (jnp.dtype(preds.dtype).itemsize, jnp.dtype(target.dtype).itemsize)
    sub_mult = _SUBLANES * max(1, 4 // min(itemsizes))          # 8 / 16 / 32
    target_rows = max(
        sub_mult,
        (_TARGET_TILE_BYTES // (_LANES * max(itemsizes))) // sub_mult * sub_mult,
    )
    rows = n // _LANES            # fully valid 128-lane rows (no padding anywhere)

    if rows < sub_mult:
        # Tiny input: a kernel launch is pure overhead; one fused XLA reduce.
        d = p.astype(jnp.float32) - t.astype(jnp.float32)
        return jnp.sum(d * d)

    block_rows = min(target_rows, (rows // sub_mult) * sub_mult)
    total_blocks = _cdiv(rows, block_rows)
    splits = 2 if (_num_tensorcores() >= 2 and total_blocks >= 2) else 1
    inner_steps = _cdiv(total_blocks, splits)
    apply_mask = (splits * inner_steps * block_rows) != rows
    clamp_blocks = (splits * inner_steps) != total_blocks

    n_main = rows * _LANES
    # Lane-dense slab in the ORIGINAL dtype.  For 128-aligned sizes (the common case)
    # this is a pure bitcast reshape: no jnp.pad, no extra HBM copies.
    # TODO(synk): for non-128-aligned inputs the prefix slice may still copy once; a
    # manual-DMA (memory_space=pl.ANY) variant with in-kernel tail masking would remove it.
    p2 = (p if n_main == n else p[:n_main]).reshape(rows, _LANES)
    t2 = (t if n_main == n else t[:n_main]).reshape(rows, _LANES)

    def in_map(c, i):
        blk = c * inner_steps + i
        if clamp_blocks:
            # Rectangular grid overshoot: clamp to the last real block; the kernel's
            # logical-row mask zeroes the duplicated contribution.
            blk = jnp.minimum(blk, total_blocks - 1)
        return (blk, 0)

    # 3-deep input pipelining on long reductions (compute is trivial: pipeline = pure DMA).
    bs_kwargs = {"pipeline_mode": pl.Buffered(3)} if inner_steps >= 4 else {}
    in_spec = pl.BlockSpec((block_rows, _LANES), in_map, **bs_kwargs)

    partials = pl.pallas_call(
        partial(_sse_kernel, rows_valid=rows, apply_mask=apply_mask),
        out_shape=jax.ShapeDtypeStruct((splits * _SUBLANES, _LANES), jnp.float32),
        grid=(splits, inner_steps),
        in_specs=[in_spec, in_spec],
        out_specs=pl.BlockSpec((_SUBLANES, _LANES), lambda c, i: (c, 0)),
        scratch_shapes=[pltpu.VMEM((_SUBLANES, _LANES), jnp.float32)],
        compiler_params=pltpu.CompilerParams(
            dimension_semantics=("parallel", "arbitrary"),
            vmem_limit_bytes=32 << 20,
        ),
    )(p2, t2)

    # Tiny (splits*8, 128) cross-lane/cross-core reduce outside the kernel.
    total = jnp.sum(partials)

    if n_main != n:
        # Sub-128-element tail: fused XLA reduce, negligible vs the kernel's HBM traffic.
        dt = p[n_main:].astype(jnp.float32) - t[n_main:].astype(jnp.float32)
        total = total + jnp.sum(dt * dt)
    return total


def sse_and_count(preds, target):
    """(sum_squared_error, n_elements). Count is compile-time known; no kernel output."""
    assert preds.shape == target.shape, "preds/target shape mismatch"
    return _sse_pallas(preds, target), jnp.float32(preds.size)


class MeanSquaredErrorMetric:
    """Minimal torchmetrics.MeanSquaredError equivalent (state in JAX scalars)."""

    def __init__(self):
        self.reset()

    def reset(self):
        self._sum_squared_error = jnp.float32(0.0)
        self._total = jnp.float32(0.0)

    def update(self, preds, target):
        s, c = sse_and_count(preds, target)
        self._sum_squared_error = self._sum_squared_error + s
        self._total = self._total + c

    def compute(self):
        return self._sum_squared_error / self._total

    def __call__(self, preds, target):
        # torchmetrics Metric.forward semantics: the returned value is the metric on
        # this batch alone AND the batch is folded into the running state.  Computing
        # the Pallas reduction once and reusing (s, c) for both is mathematically
        # identical to cache -> reset -> update -> compute -> restore -> update,
        # while halving kernel launches / HBM traffic per forward.
        s, c = sse_and_count(preds, target)
        batch_value = s / c
        self._sum_squared_error = self._sum_squared_error + s
        self._total = self._total + c
        return batch_value


class MetricWithUtils:
    """Union class for metric and metric utils parameters (JAX/Pallas version)."""

    # TODO(synk): torchmetrics' generic state caching / distributed sync has no kernel
    # equivalent; host-side Python bookkeeping reproduces the forward semantics.

    def __init__(self, metric, mapping, log_name):
        self._metric = metric
        self._mapping = mapping
        self._log_name = log_name

    @property
    def metric(self):
        return self._metric

    @property
    def log_name(self):
        return self._log_name

    @property
    def mapping(self):
        return self._mapping

    def forward(self, *args, **kwargs):
        return self._metric(*args, **kwargs)

    # Allow module-call style like nn.Module
    __call__ = forward

    def update(self, *args, **kwargs):
        self._metric.update(*args, **kwargs)

    def compute(self):
        return self._metric.compute()

    def reset(self):
        self._metric.reset()


if __name__ == "__main__":
    key = jax.random.PRNGKey(0)
    k_p, k_t, k_p2, k_t2 = jax.random.split(key, 4)
    # Small NCHW batch consistent with a typical task output (preds vs target).
    preds = jax.random.normal(k_p, (2, 4, 16, 16), dtype=jnp.float32)
    target = jax.random.normal(k_t, (2, 4, 16, 16), dtype=jnp.float32)

    mwu = MetricWithUtils(
        metric=MeanSquaredErrorMetric(),
        mapping={"preds": "prediction", "target": "gt"},
        log_name="mse",
    )

    # forward: batch metric value (also accumulates into the running state)
    batch_mse = jax.block_until_ready(mwu.forward(preds, target))
    running_mse = jax.block_until_ready(mwu.compute())

    ref = jnp.mean((preds - target) ** 2)
    assert jnp.allclose(batch_mse, ref, rtol=1e-5, atol=1e-6), (batch_mse, ref)
    assert jnp.allclose(running_mse, ref, rtol=1e-5, atol=1e-6), (running_mse, ref)

    # second batch with a row count that does NOT divide the block (9 rows of 128):
    # exercises the no-pad path with in-kernel edge-block masking.
    preds2 = jax.random.normal(k_p2, (3, 384), dtype=jnp.float32)
    target2 = jax.random.normal(k_t2, (3, 384), dtype=jnp.float32)
    mwu.update(preds2, target2)
    running_mse2 = jax.block_until_ready(mwu.compute())
    ref2 = (jnp.sum((preds - target) ** 2) + jnp.sum((preds2 - target2) ** 2)) / (
        preds.size + preds2.size
    )
    assert jnp.allclose(running_mse2, ref2, rtol=1e-5, atol=1e-6), (running_mse2, ref2)

    print("KERNEL_OK")
</pallas_src>

<mosaic_0001>
module attributes {stable_mosaic.version = 11 : i64} {
  func.func @_sse_kernel(%arg0: i32, %arg1: i32, %arg2: memref<16x128xf32, #tpu.memory_space<vmem>>, %arg3: memref<16x128xf32, #tpu.memory_space<vmem>>, %arg4: memref<8x128xf32, #tpu.memory_space<vmem>>, %arg5: memref<8x128xf32, #tpu.memory_space<vmem>>) attributes {dimension_semantics = [#tpu.dimension_semantics<parallel>, #tpu.dimension_semantics<arbitrary>], iteration_bounds = array<i64: 1, 1>, scalar_prefetch = 0 : i64, scratch_operands = 1 : i64, tpu.core_type = #tpu.core_type<tc>, window_params = [{transform_indices = @transform_0, window_bounds = array<i64: 16, 128>}, {transform_indices = @transform_1, window_bounds = array<i64: 16, 128>}, {transform_indices = @transform_2, window_bounds = array<i64: 8, 128>}]} {
    %c0_i32 = arith.constant 0 : i32
    %0 = arith.cmpi eq, %arg1, %c0_i32 : i32
    %1 = arith.extui %0 : i1 to i32
    %c0_i32_0 = arith.constant 0 : i32
    %2 = arith.cmpi ne, %1, %c0_i32_0 : i32
    scf.if %2 {
      %cst_10 = arith.constant 0.000000e+00 : f32
      %15 = vector.broadcast %cst_10 : f32 to vector<8x128xf32>
      %c0_11 = arith.constant 0 : index
      %c0_12 = arith.constant 0 : index
      %16 = vector.load %arg5[%c0_11, %c0_12] : memref<8x128xf32, #tpu.memory_space<vmem>>, vector<8x128xf32>
      tpu.vector_store %arg5[%c0_11, %c0_12], %15 {strides = array<i32>} : memref<8x128xf32, #tpu.memory_space<vmem>>, vector<8x128xf32>,
    } else {
    }
    %c0 = arith.constant 0 : index
    %c0_1 = arith.constant 0 : index
    %3 = vector.load %arg2[%c0, %c0_1] : memref<16x128xf32, #tpu.memory_space<vmem>>, vector<16x128xf32>
    %c0_2 = arith.constant 0 : index
    %c0_3 = arith.constant 0 : index
    %4 = vector.load %arg3[%c0_2, %c0_3] : memref<16x128xf32, #tpu.memory_space<vmem>>, vector<16x128xf32>
    %5 = arith.subf %3, %4 : vector<16x128xf32>
    %6 = arith.mulf %5, %5 : vector<16x128xf32>
    %c0_4 = arith.constant 0 : index
    %c0_5 = arith.constant 0 : index
    %7 = vector.load %arg5[%c0_4, %c0_5] : memref<8x128xf32, #tpu.memory_space<vmem>>, vector<8x128xf32>
    %8 = vector.shape_cast %6 : vector<16x128xf32> to vector<2x8x128xf32>
    %cst = arith.constant dense<0.000000e+00> : vector<8x128xf32>
    %9 = vector.multi_reduction <add>, %8, %cst [0] : vector<2x8x128xf32> to vector<8x128xf32>
    %10 = arith.addf %7, %9 : vector<8x128xf32>
    %c0_6 = arith.constant 0 : index
    %c0_7 = arith.constant 0 : index
    %11 = vector.load %arg5[%c0_6, %c0_7] : memref<8x128xf32, #tpu.memory_space<vmem>>, vector<8x128xf32>
    tpu.vector_store %arg5[%c0_6, %c0_7], %10 {strides = array<i32>} : memref<8x128xf32, #tpu.memory_space<vmem>>, vector<8x128xf32>,
    %c0_i32_8 = arith.constant 0 : i32
    %12 = arith.cmpi eq, %arg1, %c0_i32_8 : i32
    %13 = arith.extui %12 : i1 to i32
    %c0_i32_9 = arith.constant 0 : i32
    %14 = arith.cmpi ne, %13, %c0_i32_9 : i32
    scf.if %14 {
      %c0_10 = arith.constant 0 : index
      %c0_11 = arith.constant 0 : index
      %15 = vector.load %arg5[%c0_10, %c0_11] : memref<8x128xf32, #tpu.memory_space<vmem>>, vector<8x128xf32>
      %c0_12 = arith.constant 0 : index
      %c0_13 = arith.constant 0 : index
      %16 = vector.load %arg4[%c0_12, %c0_13] : memref<8x128xf32, #tpu.memory_space<vmem>>, vector<8x128xf32>
      tpu.vector_store %arg4[%c0_12, %c0_13], %15 {strides = array<i32>} : memref<8x128xf32, #tpu.memory_space<vmem>>, vector<8x128xf32>,
    } else {
    }
    return
  }
  func.func @transform_0(%arg0: i32, %arg1: i32) -> (i32, i32) {
    %c1_i32 = arith.constant 1 : i32
    %0 = arith.muli %arg0, %c1_i32 : i32
    %1 = arith.addi %0, %arg1 : i32
    %c0_i32 = arith.constant 0 : i32
    %c0_i32_0 = arith.constant 0 : i32
    return %1, %c0_i32 : i32, i32
  }
  func.func @transform_1(%arg0: i32, %arg1: i32) -> (i32, i32) {
    %c1_i32 = arith.constant 1 : i32
    %0 = arith.muli %arg0, %c1_i32 : i32
    %1 = arith.addi %0, %arg1 : i32
    %c0_i32 = arith.constant 0 : i32
    %c0_i32_0 = arith.constant 0 : i32
    return %1, %c0_i32 : i32, i32
  }
  func.func @transform_2(%arg0: i32, %arg1: i32) -> (i32, i32) {
    %c0_i32 = arith.constant 0 : i32
    %c0_i32_0 = arith.constant 0 : i32
    return %arg0, %c0_i32 : i32, i32
  }
}

</mosaic_0001>

<bundles_post_ra>
// kernel: _sse_pallas.1
= control target key start
LH: loop header
LB: loop body
LE: loop exit
PB: predicated region body
PF: predicated region fallthrough
CT: control target
= control target key end

     0   :  { %s123_s0 = inlined_call_operand.vmem [shape: f32[16,128], index: 0, kind: input, shape index: {}]   ;;  %s124_s1 = inlined_call_operand.vmem [shape: f32[16,128], index: 1, kind: input, shape index: {}]   ;;  %s125_s2 = inlined_call_operand.vmem [shape: f32[8,128], index: 2, kind: output, shape index: {}]  }
   0x1   :  { %v60_v0 = vld [vmem:[%s123_s0] sm:$0xff]  ;;  %v61_v1 = vld [vmem:[%s123_s0 + $0x8] sm:$0xff] }
   0x2   :  { %v62_v2 = vld [vmem:[%s124_s1] sm:$0xff]  ;;  %v63_v3 = vld [vmem:[%s124_s1 + $0x8] sm:$0xff] }
   0x3   :  { %v64_v4 = vsub.f32 %v60_v0, %v62_v2  ;;  %v65_v5 = vsub.f32 %v61_v1, %v63_v3 }
   0x5   :  { %v66_v6 = vmul.f32 %v64_v4, %v64_v4  ;;  %v67_v7 = vmul.f32 %v65_v5, %v65_v5 }
   0x7   :  { %v69_v8 = vadd.f32 %v67_v7, %v66_v6 }
   0x9   :  { %76 = vst [vmem:[%s125_s2] sm:$0xff] %v69_v8 }

</bundles_post_ra>
